<compile_context>
chip_gen: v5e
topology: v5e:2x2
jax: 0.10.0
libtpu: 0.0.40
codegen_flags: <defaults>
</compile_context>

<pallas_src>
import jax
import jax.numpy as jnp
from jax.experimental import pallas as pl
from jax.experimental.pallas import tpu as pltpu


def binary_mlp_kernel(x_ref, w1_ref, b1_ref, w2_ref, b2_ref, o_ref):
    """One batch tile.

    x_ref:  (TB, D_in)  VMEM, streamed per grid step
    w1_ref: (H, D_in)   VMEM (PyTorch Linear layout), resident across grid steps
    b1_ref: (H, 1)      VMEM, resident
    w2_ref: (H, 1)      VMEM, resident (== linear_2.weight transposed)
    b2_ref: (1, 1)      SMEM scalar
    o_ref:  (1, TB)     VMEM, lane-dense output row
    """
    # hT[h, b] = sum_d W1[h, d] * x[b, d]  -> (H, TB); one f32 MXU matmul
    # (dimension_numbers contract dim 1 of both operands: the "NT" matmul form).
    h_t = jax.lax.dot_general(
        w1_ref[...], x_ref[...],
        dimension_numbers=(((1,), (1,)), ((), ())),
        preferred_element_type=jnp.float32,
    )
    h_t = jnp.maximum(h_t + b1_ref[...], 0.0)              # bias + ReLU (VPU)

    # Second layer has output width 1: VPU multiply + sublane reduce (keeps the MXU
    # free and produces a lane-dense (1, TB) result for an unmasked store).
    z = jnp.sum(h_t * w2_ref[...], axis=0, keepdims=True) + b2_ref[0, 0]
    o_ref[...] = jax.nn.sigmoid(z).astype(o_ref.dtype)


def binary_forward(x, w1, b1, w2, b2, *, block_b=512):
    """Forward pass of the Binary module.

    x:  (B, D_in) f32
    w1: (H, D_in) f32  -- nn.Linear(input, hidden).weight layout
    b1: (H,)      f32
    w2: (1, H)    f32  -- nn.Linear(hidden, 1).weight layout
    b2: (1,)      f32
    returns (B, 1) f32 = sigmoid(relu(x @ w1.T + b1) @ w2.T + b2)
    """
    B, d_in = x.shape
    H = w1.shape[0]

    # Lane/sublane-friendly batch tile.  Multi-tile case needs TB % 128 == 0 (lane-dense
    # output blocks); single-tile case only needs TB % 8 == 0 (block == full array).
    if B <= block_b:
        tb = max(8, pl.cdiv(B, 8) * 8)
    else:
        tb = block_b
    b_pad = pl.cdiv(B, tb) * tb
    if b_pad != B:
        x = jnp.pad(x, ((0, b_pad - B), (0, 0)))
    grid = (b_pad // tb,)

    w1_k = w1.astype(jnp.float32)                  # (H, D_in)
    b1_k = b1.reshape(H, 1).astype(jnp.float32)    # (H, 1)
    w2_k = w2.reshape(H, 1).astype(jnp.float32)    # (H, 1)
    b2_k = b2.reshape(1, 1).astype(jnp.float32)    # (1, 1) SMEM scalar

    cost = pl.CostEstimate(
        flops=2 * b_pad * d_in * H + 2 * b_pad * H,
        transcendentals=b_pad,                     # one exp per sample (sigmoid)
        bytes_accessed=4 * (x.size + w1_k.size + b1_k.size + w2_k.size
                            + b2_k.size + b_pad),
    )

    out = pl.pallas_call(
        binary_mlp_kernel,
        out_shape=jax.ShapeDtypeStruct((1, b_pad), jnp.float32),
        grid=grid,
        in_specs=[
            pl.BlockSpec((tb, d_in), lambda i: (i, 0)),          # x: streamed tiles
            pl.BlockSpec((H, d_in), lambda i: (0, 0)),           # w1: VMEM-resident
            pl.BlockSpec((H, 1), lambda i: (0, 0)),              # b1: VMEM-resident
            pl.BlockSpec((H, 1), lambda i: (0, 0)),              # w2: VMEM-resident
            pl.BlockSpec(memory_space=pltpu.MemorySpace.SMEM),   # b2: scalar in SMEM
        ],
        out_specs=pl.BlockSpec((1, tb), lambda i: (0, i)),       # lane-dense output row
        compiler_params=pltpu.CompilerParams(
            # Batch tiles are independent -> shard across TensorCores on v7x.
            dimension_semantics=("parallel",),
        ),
        cost_estimate=cost,
    )(x, w1_k, b1_k, w2_k, b2_k)

    # (1, B_pad) lane-dense row -> PyTorch-style (B, 1) column.
    return out[0, :B].reshape(B, 1)


if __name__ == "__main__":
    # Small shapes consistent with the module: input_size=32, hidden_size=32, batch=8.
    B, D_IN, H = 8, 32, 32

    key = jax.random.PRNGKey(0)
    kx, kw1, kb1, kw2, kb2, kx2 = jax.random.split(key, 6)

    x = jax.random.normal(kx, (B, D_IN), dtype=jnp.float32)

    # Deterministic PyTorch-style Linear params (weights in (out, in) layout).
    bound1 = 1.0 / (D_IN ** 0.5)
    w1 = jax.random.uniform(kw1, (H, D_IN), jnp.float32, -bound1, bound1)
    b1 = jax.random.uniform(kb1, (H,), jnp.float32, -bound1, bound1)
    bound2 = 1.0 / (H ** 0.5)
    w2 = jax.random.uniform(kw2, (1, H), jnp.float32, -bound2, bound2)
    b2 = jax.random.uniform(kb2, (1,), jnp.float32, -bound2, bound2)

    def reference(xv):
        h = jnp.maximum(xv @ w1.T + b1, 0.0)
        return jax.nn.sigmoid(h @ w2.T + b2)

    # Single-tile run (block == full array).
    y = binary_forward(x, w1, b1, w2, b2)
    jax.block_until_ready(y)
    assert y.shape == (B, 1)
    assert jnp.allclose(y, reference(x), atol=1e-5, rtol=1e-5)

    # Multi-tile run exercising the pipelined, parallel batch grid.
    B2 = 1024
    x2 = jax.random.normal(kx2, (B2, D_IN), dtype=jnp.float32)
    y2 = binary_forward(x2, w1, b1, w2, b2)
    jax.block_until_ready(y2)
    assert y2.shape == (B2, 1)
    assert jnp.allclose(y2, reference(x2), atol=1e-5, rtol=1e-5)

    print("KERNEL_OK")
</pallas_src>

<mosaic_0001>
module attributes {stable_mosaic.version = 11 : i64} {
  func.func @binary_mlp_kernel(%arg0: i32, %arg1: memref<8x32xf32, #tpu.memory_space<vmem>>, %arg2: memref<32x32xf32, #tpu.memory_space<vmem>>, %arg3: memref<32x1xf32, #tpu.memory_space<vmem>>, %arg4: memref<32x1xf32, #tpu.memory_space<vmem>>, %arg5: memref<1x1xf32, #tpu.memory_space<smem>>, %arg6: memref<1x8xf32, #tpu.memory_space<vmem>>) attributes {dimension_semantics = [#tpu.dimension_semantics<parallel>], iteration_bounds = array<i64: 1>, scalar_prefetch = 0 : i64, scratch_operands = 0 : i64, tpu.core_type = #tpu.core_type<tc>, window_params = [{transform_indices = @transform_0, window_bounds = array<i64: 8, 32>}, {pipeline_mode = #tpu.pipeline_mode<synchronous>, transform_indices = @transform_1, window_bounds = array<i64: 32, 32>}, {pipeline_mode = #tpu.pipeline_mode<synchronous>, transform_indices = @transform_2, window_bounds = array<i64: 32, 1>}, {pipeline_mode = #tpu.pipeline_mode<synchronous>, transform_indices = @transform_3, window_bounds = array<i64: 32, 1>}, {transform_indices = @transform_4, window_bounds = array<i64: 1, 1>}, {transform_indices = @transform_5, window_bounds = array<i64: 1, 8>}]} {
    %c0 = arith.constant 0 : index
    %c0_0 = arith.constant 0 : index
    %0 = vector.load %arg2[%c0, %c0_0] : memref<32x32xf32, #tpu.memory_space<vmem>>, vector<32x32xf32>
    %c0_1 = arith.constant 0 : index
    %c0_2 = arith.constant 0 : index
    %1 = vector.load %arg1[%c0_1, %c0_2] : memref<8x32xf32, #tpu.memory_space<vmem>>, vector<8x32xf32>
    %cst = arith.constant dense<0.000000e+00> : vector<32x8xf32>
    %2 = tpu.matmul %0, %1, %cst {dimension_numbers = #tpu.dot_dimension_numbers<[1], [1], [0], [0], [0, 0, 1, 0], [], []>} : vector<32x32xf32>, vector<8x32xf32>, vector<32x8xf32> -> vector<32x8xf32>
    %c0_3 = arith.constant 0 : index
    %c0_4 = arith.constant 0 : index
    %3 = vector.load %arg3[%c0_3, %c0_4] : memref<32x1xf32, #tpu.memory_space<vmem>>, vector<32x1xf32>
    %4 = vector.broadcast %3 : vector<32x1xf32> to vector<32x8xf32>
    %5 = arith.addf %2, %4 : vector<32x8xf32>
    %cst_5 = arith.constant 0.000000e+00 : f32
    %6 = vector.broadcast %cst_5 : f32 to vector<32x8xf32>
    %7 = arith.maximumf %5, %6 : vector<32x8xf32>
    %c0_6 = arith.constant 0 : index
    %c0_7 = arith.constant 0 : index
    %8 = vector.load %arg4[%c0_6, %c0_7] : memref<32x1xf32, #tpu.memory_space<vmem>>, vector<32x1xf32>
    %9 = vector.broadcast %8 : vector<32x1xf32> to vector<32x8xf32>
    %10 = arith.mulf %7, %9 : vector<32x8xf32>
    %cst_8 = arith.constant dense<0.000000e+00> : vector<8xf32>
    %11 = vector.multi_reduction <add>, %10, %cst_8 [0] : vector<32x8xf32> to vector<8xf32>
    %12 = vector.shape_cast %11 : vector<8xf32> to vector<1x8xf32>
    %c0_9 = arith.constant 0 : index
    %c0_10 = arith.constant 0 : index
    %13 = memref.load %arg5[%c0_9, %c0_10] : memref<1x1xf32, #tpu.memory_space<smem>>
    %14 = vector.broadcast %13 : f32 to vector<1x8xf32>
    %15 = arith.addf %12, %14 : vector<1x8xf32>
    %16 = arith.negf %15 : vector<1x8xf32>
    %17 = math.exp %16 : vector<1x8xf32>
    %cst_11 = arith.constant 1.000000e+00 : f32
    %18 = vector.broadcast %cst_11 : f32 to vector<1x8xf32>
    %19 = arith.addf %18, %17 : vector<1x8xf32>
    %20 = arith.divf %18, %19 : vector<1x8xf32>
    %c0_12 = arith.constant 0 : index
    %c0_13 = arith.constant 0 : index
    %21 = vector.load %arg6[%c0_12, %c0_13] : memref<1x8xf32, #tpu.memory_space<vmem>>, vector<1x8xf32>
    tpu.vector_store %arg6[%c0_12, %c0_13], %20 {strides = array<i32>} : memref<1x8xf32, #tpu.memory_space<vmem>>, vector<1x8xf32>,
    return
  }
  func.func @transform_0(%arg0: i32) -> (i32, i32) {
    %c0_i32 = arith.constant 0 : i32
    %c0_i32_0 = arith.constant 0 : i32
    return %arg0, %c0_i32 : i32, i32
  }
  func.func @transform_1(%arg0: i32) -> (i32, i32) {
    %c0_i32 = arith.constant 0 : i32
    %c0_i32_0 = arith.constant 0 : i32
    %c0_i32_1 = arith.constant 0 : i32
    return %c0_i32, %c0_i32_0 : i32, i32
  }
  func.func @transform_2(%arg0: i32) -> (i32, i32) {
    %c0_i32 = arith.constant 0 : i32
    %c0_i32_0 = arith.constant 0 : i32
    %c0_i32_1 = arith.constant 0 : i32
    return %c0_i32, %c0_i32_0 : i32, i32
  }
  func.func @transform_3(%arg0: i32) -> (i32, i32) {
    %c0_i32 = arith.constant 0 : i32
    %c0_i32_0 = arith.constant 0 : i32
    %c0_i32_1 = arith.constant 0 : i32
    return %c0_i32, %c0_i32_0 : i32, i32
  }
  func.func @transform_4(%arg0: i32) -> (i32, i32) {
    %c0_i32 = arith.constant 0 : i32
    %c0_i32_0 = arith.constant 0 : i32
    %c0_i32_1 = arith.constant 0 : i32
    return %c0_i32, %c0_i32_0 : i32, i32
  }
  func.func @transform_5(%arg0: i32) -> (i32, i32) {
    %c0_i32 = arith.constant 0 : i32
    %c0_i32_0 = arith.constant 0 : i32
    return %c0_i32, %arg0 : i32, i32
  }
}

</mosaic_0001>

<bundles_post_ra>
// kernel: tpu_custom_call.1
= control target key start
LH: loop header
LB: loop body
LE: loop exit
PB: predicated region body
PF: predicated region fallthrough
CT: control target
= control target key end

     0   :  { %vm51_vm0 = vcmask 261120   ;;  %v226_v1 = vmov 0   ;;  %s315_s0 = inlined_call_operand.vmem [shape: f32[8,32], index: 0, kind: input, shape index: {}]   ;;  %s316_s1 = inlined_call_operand.vmem [shape: f32[32,32], index: 1, kind: input, shape index: {}]   ;;  %s317_s2 = inlined_call_operand.vmem [shape: f32[32,1], index: 2, kind: input, shape index: {}]   ;;  %s318_s3 = inlined_call_operand.vmem [shape: f32[32,1], index: 3, kind: input, shape index: {}]   ;;  %s319_s4 = inlined_call_operand.<no memory space> [shape: f32[1,1], index: 4, kind: input, shape index: {}]   ;;  %s320_s5 = inlined_call_operand.hbm [shape: f32[1,8], index: 5, kind: output, shape index: {}]  }
   0x1   :  { %v26_v0 = vld [vmem:[%s315_s0] sm:$0xff]  ;;  %194 = vset.pattern.permute.xlu1 %v226_v1  ;;  %193 = vset.pattern.permute.xlu0 %v226_v1  ;;  %v29_v2 = vld [vmem:[%s317_s2 + $0x10] sm:$0xff]  ;;  %v23_v5 = vld [vmem:[%s316_s1 + $0x8] sm:$0xff] }
   0x2   :  { %v27_v3 = vld [vmem:[%s317_s2] sm:$0xff]  ;;  %182 = vmatpush.xpose.msk.msra.mxu0 %vm51_vm0, %v26_v0  ;;  %188 = vmatpush.xpose.msk.msra.mxu1 %vm51_vm0, %v26_v0  ;;  %v24_v6 = vld [vmem:[%s316_s1 + $0x10] sm:$0xff]  ;;  %v25_v7 = vld [vmem:[%s316_s1 + $0x18] sm:$0xff] }
   0x3   :  { %v22_v4 = vld [vmem:[%s316_s1] sm:$0xff]  ;;  %189 = vmatpush.xpose.msk.msra.mxu2 %vm51_vm0, %v26_v0  ;;  %190 = vmatpush.xpose.msk.msra.mxu3 %vm51_vm0, %v26_v0 }
   0x4   :  { %43 = vperm.xlu1 %194, %v29_v2   ;;  %33 = vperm.xlu0 %193, %v27_v3  }
   0x5   :  { %11 = vsyncpa [#allocation4], 0  ;;  %183 = vmatmul.msk.f32.vlgmr.msra.gmra.mxu0 %vm51_vm0, %v22_v4  ;;  %184 = vmatmul.msk.f32.vlgmr.msra.gmra.mxu1 %vm51_vm0, %v23_v5  ;;  %v100_v8 = vld [vmem:[%s318_s3] sm:$0xff]  ;;  %v30_v9 = vld [vmem:[%s317_s2 + $0x18] sm:$0xff]  ;;  %vm128_vm1 = vcmask 64512   ;;  %v143_v50 = vstv %s319_s4  ;;  %s227_s17 = smov [#allocation3]  }
   0x6   :  { %185 = vmatmul.msk.f32.vlgmr.msra.gmra.mxu2 %vm51_vm0, %v24_v6  ;;  %186 = vmatmul.msk.f32.vlgmr.msra.gmra.mxu3 %vm51_vm0, %v25_v7  ;;  %v28_v10 = vld [vmem:[%s317_s2 + $0x8] sm:$0xff]  ;;  %v103_v12 = vld [vmem:[%s318_s3 + $0x18] sm:$0xff]  ;;  %v102_v13 = vld [vmem:[%s318_s3 + $0x10] sm:$0xff]  ;;  %s171_s18 = sshll.u32 %s227_s17, 4  ;;  %s173_s4 = sshll.u32 %s320_s5, 4  ;;  %vm164_vm5 = vcmask 57344   ;;  %s172_s18 = int_to_ptr.vmem [resolvable:$true] %s171_s18  ;;  %s174_s4 = int_to_ptr.hbm [resolvable:$true] %s173_s4 }
   0x7   :  { %195 = vset.pattern.permute.xlu2 %v226_v1  ;;  %v101_v11 = vld [vmem:[%s318_s3 + $0x8] sm:$0xff] }
   0x8   :  { %106 = vperm.xlu2 %195, %v100_v8  }
   0xc   :  { %48 = vperm.xlu1 %194, %v30_v9   ;;  %38 = vperm.xlu0 %193, %v28_v10  }
  0x10   :  { %111 = vperm.xlu2 %195, %v101_v11  }
  0x14   :  { %121 = vperm.xlu1 %194, %v103_v12   ;;  %116 = vperm.xlu0 %193, %v102_v13  }
  0x62   :  { %v107_v16 = vpop.permute.xlu2 %106 }
  0x6a   :  { %v112_v25 = vpop.permute.xlu2 %111 }
  0x76   :  { %v34_v14 = vpop.permute.xlu0 %33  ;;  %v44_v15 = vpop.permute.xlu1 %43 }
  0x7e   :  { %v39_v17 = vpop.permute.xlu0 %38  ;;  %v49_v20 = vpop.permute.xlu1 %48 }
  0x82   :  { %v84_v18 = vpop.f32.mrf.mxu0  ;;  %v87_v19 = vpop.f32.mrf.mxu1 }
  0x83   :  { %v85_v21 = vadd.f32 %v84_v18, %v34_v14  ;;  %v88_v22 = vadd.f32 %v87_v19, %v39_v17 }
  0x85   :  { %v96_v23 = vmax.f32 %v85_v21, 0.0  ;;  %v97_v24 = vmax.f32 %v88_v22, 0.0 }
  0x86   :  { %v122_v36 = vpop.permute.xlu1 %121  ;;  %v117_v37 = vpop.permute.xlu0 %116 }
  0x87   :  { %v124_v26 = vmul.f32 %v107_v16, %v96_v23  ;;  %v125_v27 = vmul.f32 %v112_v25, %v97_v24 }
  0x89   :  { %v90_v28 = vpop.f32.mrf.mxu2  ;;  %v93_v29 = vpop.f32.mrf.mxu3  ;;  %v129_v32 = vsel %vm128_vm1, %v124_v26, 0.0  ;;  %v130_v33 = vsel %vm128_vm1, %v125_v27, 0.0 }
  0x8a   :  { %v91_v30 = vadd.f32 %v90_v28, %v44_v15  ;;  %v94_v31 = vadd.f32 %v93_v29, %v49_v20  ;;  %v131_v40 = vadd.f32 %v130_v33, %v129_v32 }
  0x8c   :  { %v98_v34 = vmax.f32 %v91_v30, 0.0  ;;  %v99_v35 = vmax.f32 %v94_v31, 0.0 }
  0x8e   :  { %v126_v38 = vmul.f32 %v117_v37, %v98_v34  ;;  %v127_v39 = vmul.f32 %v122_v36, %v99_v35 }
  0x90   :  { %v132_v41 = vsel %vm128_vm1, %v126_v38, 0.0  ;;  %v134_v43 = vsel %vm128_vm1, %v127_v39, 0.0 }
  0x91   :  { %v133_v42 = vadd.f32 %v132_v41, %v131_v40 }
  0x93   :  { %v135_v44 = vadd.f32 %v134_v43, %v133_v42 }
  0x95   :  { %v136_v45 = vrot.slane %v135_v44, 4 }
  0x97   :  { %v137_v46 = vadd.f32 %v136_v45, %v135_v44 }
  0x99   :  { %v138_v47 = vrot.slane %v137_v46, 2 }
  0x9b   :  { %v139_v48 = vadd.f32 %v138_v47, %v137_v46 }
  0x9d   :  { %v140_v49 = vrot.slane %v139_v48, 1 }
  0x9f   :  { %v141_v51 = vadd.f32 %v140_v49, %v139_v48 }
  0xa1   :  { %v144_v52 = vadd.f32 %v143_v50, %v141_v51 }
  0xa3   :  { %v187_v53 = vmul.f32 -1.442695, %v144_v52 }
  0xa5   :  { %196 = vpow2.f32 %v187_v53 }
  0xab   :  { %v197_v54 = vpop.eup %196 }
  0xac   :  { %v148_v55 = vadd.f32 1.0, %v197_v54 }
  0xae   :  { %198 = vrcp.f32 %v148_v55  ;;  %v160_v59 = vand.u32 2147483648, %v148_v55  ;;  %v158_v61 = vand.u32 2147483647, %v148_v55  ;;  %vm154_vm3 = vweird.f32 %v148_v55 }
  0xb0   :  { %v161_v63 = vor.u32 1.1754944e-38, %v160_v59  ;;  %vm159_vm6 = vcmp.eq.f32.partialorder %v158_v61, 8.507059e+37 }
  0xb4   :  { %v199_v56 = vpop.eup %198 }
  0xb5   :  { %v150_v57 = vmul.f32 %v199_v56, %v148_v55  ;;  %vm155_vm2 = vweird.f32 %v199_v56 }
  0xb6   :  { %vm156_vm4 = vmor %vm154_vm3, %vm155_vm2 }
  0xb7   :  { %v151_v58 = vsub.f32 1.0, %v150_v57 }
  0xb9   :  { %v152_v60 = vmul.f32 %v199_v56, %v151_v58 }
  0xbb   :  { %v153_v62 = vadd.f32 %v199_v56, %v152_v60 }
  0xbd   :  { %v157_v0 = vsel %vm156_vm4, %v199_v56, %v153_v62 }
  0xbe   :  { %v162_v1 = vsel %vm159_vm6, %v161_v63, %v157_v0 }
  0xbf   :  { %165 = vst.msk [vmem:[#allocation3] sm:$0x1] %vm164_vm5, %v162_v1 }
  0xc0   :  { %176 = dma.vmem_to_hbm [thread:$0]  %s172_s18, 16, %s174_s4, [#allocation4]  }
  0xc1   :  { %224 = dma.done.wait [#allocation4], 16  }
  0xc2   :  { %225 = vsyncadd [#allocation4], 4294967280 }
  0xc3   :  { %181 = vsyncpa [#allocation4], 1 }

</bundles_post_ra>
